<compile_context>
chip_gen: v5e
topology: v5e:2x2
jax: 0.10.0
libtpu: 0.0.40
codegen_flags: <defaults>
</compile_context>

<pallas_src>
import jax
import jax.numpy as jnp
from jax import lax
from jax.experimental import pallas as pl
from jax.experimental.pallas import tpu as pltpu


def _round_up(x, m):
    return ((x + m - 1) // m) * m


def _cdiv(a, b):
    return -(-a // b)


def _project_c_dist_kernel(g0_ref, g1_ref, l_ref, d0_ref,
                           lnew_ref, dp0_ref, dp1_ref):
    # g0/g1: [1, 5, T] rows: xyz(0:3), w(3), a(4);  l/d0: [1, 1, T]
    p0 = g0_ref[:, 0:3, :]
    p1 = g1_ref[:, 0:3, :]
    w0 = g0_ref[:, 3:4, :]
    w1 = g1_ref[:, 3:4, :]
    a0 = g0_ref[:, 4:5, :]
    a1 = g1_ref[:, 4:5, :]

    n = p0 - p1                                            # edge vector [1,3,T]
    # Unrolled |n|^2 over the three row slices: pure VPU, avoids a cross-sublane
    # XLU reduce/relayout over a 3/8-occupied vreg group.
    d2 = (n[:, 0:1, :] * n[:, 0:1, :]
          + n[:, 1:2, :] * n[:, 1:2, :]
          + n[:, 2:3, :] * n[:, 2:3, :])                   # [1,1,T]
    inv_d = lax.rsqrt(d2)                                  # EUP
    d = jnp.sqrt(d2)                                       # EUP (exact; kernel is HBM-bound)
    # NOTE: d == 0 (coincident endpoints) yields NaN in dp*, matching the reference.

    c = d - d0_ref[...]                                    # constraint value
    a = (a0 + a1) * 0.5                                    # avg compliance
    s = w0 + w1                                            # sum of inverse masses
    l = l_ref[...]

    # Reference does S[S==0] = inf so L_delta becomes 0; mask explicitly so the
    # reciprocal never sees inf.
    denom_inv = pl.reciprocal(s + a, approx=False)         # EUP
    l_delta = jnp.where(s == 0.0, 0.0, (-c - a * l) * denom_inv)

    lnew_ref[...] = l + l_delta                            # L_new
    scale = l_delta * inv_d                                # L_delta / |n|
    dp0_ref[...] = (w0 * scale) * n                        # w0 * L_delta * N_norm
    dp1_ref[...] = (w1 * scale) * n                        # w1 * L_delta * N_norm


def project_c_dist_batch(V_predict, L, V_w, V_compliance, C_dist, C_init_d,
                         *, tile_nc=65536):
    """V_predict:[B,Nv,3]  L:[B,Nc,1]  V_w,V_compliance:[B,Nv,1]
       C_dist:[Nc,2] int  C_init_d:[Nc,1]"""
    B, Nv, _ = V_predict.shape
    Nc = C_dist.shape[0]
    dtype = V_predict.dtype

    LANE = 128
    # Balanced tiles decoupled from padding: num_tiles = cdiv(Nc, tile_nc),
    # tile = round_up(cdiv(Nc, num_tiles), 128) -> pad waste < 128 * num_tiles.
    num_tiles = max(1, _cdiv(Nc, tile_nc))
    tile = _round_up(_cdiv(Nc, num_tiles), LANE)
    # v7x has 2 TensorCores: keep at least 2 grid steps when possible.
    if num_tiles * B < 2 and Nc > LANE:
        num_tiles = 2
        tile = _round_up(_cdiv(Nc, num_tiles), LANE)
    Nc_pad = num_tiles * tile
    pad = Nc_pad - Nc

    idx0 = C_dist[:, 0].astype(jnp.int32)
    idx1 = C_dist[:, 1].astype(jnp.int32)
    if pad:
        # Pad the two endpoints with DISTINCT vertices so padded lanes stay
        # finite (no rsqrt(0) -> NaN), even though they are sliced off below.
        idx0_p = jnp.pad(idx0, (0, pad), constant_values=0)
        idx1_p = jnp.pad(idx1, (0, pad), constant_values=min(1, Nv - 1))
    else:
        idx0_p, idx1_p = idx0, idx1

    # Per-vertex packed table, transposed ONCE to [B, 5, Nv] (Nv << Nc typically)
    # so the gathers below produce the kernel's [B, 5, Nc_pad] layout directly.
    V_all_T = jnp.concatenate(
        [jnp.transpose(V_predict, (0, 2, 1)),
         jnp.transpose(V_w, (0, 2, 1)).astype(dtype),
         jnp.transpose(V_compliance, (0, 2, 1)).astype(dtype)],
        axis=1)                                                     # [B, 5, Nv]
    g0 = jnp.take(V_all_T, idx0_p, axis=2)                          # [B, 5, Nc_pad]
    g1 = jnp.take(V_all_T, idx1_p, axis=2)                          # [B, 5, Nc_pad]

    # [B, Nc, 1] -> [B, 1, Nc] and [Nc, 1] -> [1, 1, Nc] are free reshapes.
    l_t = L.reshape(B, 1, Nc).astype(dtype)
    d0_t = C_init_d.reshape(1, 1, Nc).astype(dtype)
    if pad:
        l_t = jnp.pad(l_t, ((0, 0), (0, 0), (0, pad)))
        d0_t = jnp.pad(d0_t, ((0, 0), (0, 0), (0, pad)), constant_values=1.0)

    batch_map = lambda c, b: (b, 0, c)
    shared_map = lambda c, b: (0, 0, c)   # d0 block reused across consecutive b steps

    lnew, dp0, dp1 = pl.pallas_call(
        _project_c_dist_kernel,
        grid=(num_tiles, B),              # Nc-tile axis outermost, batch innermost
        in_specs=[
            pl.BlockSpec((1, 5, tile), batch_map),
            pl.BlockSpec((1, 5, tile), batch_map),
            pl.BlockSpec((1, 1, tile), batch_map),
            pl.BlockSpec((1, 1, tile), shared_map),
        ],
        out_specs=(
            pl.BlockSpec((1, 1, tile), batch_map),
            pl.BlockSpec((1, 3, tile), batch_map),
            pl.BlockSpec((1, 3, tile), batch_map),
        ),
        out_shape=(
            jax.ShapeDtypeStruct((B, 1, Nc_pad), dtype),
            jax.ShapeDtypeStruct((B, 3, Nc_pad), dtype),
            jax.ShapeDtypeStruct((B, 3, Nc_pad), dtype),
        ),
        compiler_params=pltpu.CompilerParams(
            dimension_semantics=("parallel", "parallel")),
    )(g0, g1, l_t, d0_t)

    L_new = lnew[:, :, :Nc].reshape(B, Nc, 1).astype(L.dtype)       # free reshape

    # Scatter in the [B, 3, Nv] layout so the large [*, Nc] kernel outputs never
    # need a transpose; only the small vertex array is transposed back at the end.
    # Matches PyTorch `x[:, idx] += y` semantics: sequential, non-accumulating
    # gather-add-scatter (second update reads the result of the first).
    V_T = V_all_T[:, 0:3, :]                                        # [B, 3, Nv]
    V_T = V_T.at[:, :, idx0].set(V_T[:, :, idx0] + dp0[:, :, :Nc])
    V_T = V_T.at[:, :, idx1].set(V_T[:, :, idx1] - dp1[:, :, :Nc])
    V_new = jnp.transpose(V_T, (0, 2, 1)).astype(V_predict.dtype)   # [B, Nv, 3]
    return V_new, L_new


def project_c_dist_ref(V_predict, L, V_w, V_compliance, C_dist, C_init_d):
    """Pure-JAX reference mirroring the PyTorch forward."""
    idx0, idx1 = C_dist[:, 0], C_dist[:, 1]
    N = V_predict[:, idx0] - V_predict[:, idx1]
    D = jnp.linalg.norm(N, axis=-1, keepdims=True)
    C = D - C_init_d
    N_norm = N / D
    A = (V_compliance[:, idx0] + V_compliance[:, idx1]) / 2
    S = V_w[:, idx0] + V_w[:, idx1]
    S = jnp.where(S == 0, jnp.inf, S)
    L_delta = (-C - A * L) / (S + A)
    L_new = L + L_delta
    V_new = V_predict
    V_new = V_new.at[:, idx0].set(V_new[:, idx0] + V_w[:, idx0] * L_delta * N_norm)
    V_new = V_new.at[:, idx1].set(V_new[:, idx1] - V_w[:, idx1] * L_delta * N_norm)
    return V_new, L_new


if __name__ == "__main__":
    key = jax.random.PRNGKey(0)
    B, Nv, Nc = 2, 16, 8
    k1, k2, k3, k4, k5 = jax.random.split(key, 5)

    V_predict = jax.random.normal(k1, (B, Nv, 3), dtype=jnp.float32)
    L = 0.1 * jax.random.normal(k2, (B, Nc, 1), dtype=jnp.float32)
    V_w = jnp.abs(jax.random.normal(k3, (B, Nv, 1), dtype=jnp.float32))
    # make one constraint hit the S == 0 branch (both inverse masses zero)
    V_w = V_w.at[:, 4].set(0.0).at[:, 5].set(0.0)
    V_compliance = 1e-3 * jnp.abs(jax.random.normal(k4, (B, Nv, 1), dtype=jnp.float32))
    # disjoint vertex pairs (0,1),(2,3),... so scatter semantics are unambiguous
    C_dist = jnp.stack([jnp.arange(0, 2 * Nc, 2),
                        jnp.arange(1, 2 * Nc, 2)], axis=1).astype(jnp.int32)
    C_init_d = 0.5 + jnp.abs(jax.random.normal(k5, (Nc, 1), dtype=jnp.float32))

    fn = jax.jit(project_c_dist_batch)
    V_new, L_new = fn(V_predict, L, V_w, V_compliance, C_dist, C_init_d)
    jax.block_until_ready((V_new, L_new))

    V_ref, L_ref = project_c_dist_ref(V_predict, L, V_w, V_compliance, C_dist, C_init_d)
    assert jnp.allclose(V_new, V_ref, rtol=1e-5, atol=1e-5), "V_predict_new mismatch"
    assert jnp.allclose(L_new, L_ref, rtol=1e-5, atol=1e-5), "L_new mismatch"

    print("KERNEL_OK")
</pallas_src>

<mosaic_0001>
module attributes {stable_mosaic.version = 11 : i64} {
  func.func @_project_c_dist_kernel(%arg0: i32, %arg1: i32, %arg2: memref<1x5x128xf32, #tpu.memory_space<vmem>>, %arg3: memref<1x5x128xf32, #tpu.memory_space<vmem>>, %arg4: memref<1x1x128xf32, #tpu.memory_space<vmem>>, %arg5: memref<1x1x128xf32, #tpu.memory_space<vmem>>, %arg6: memref<1x1x128xf32, #tpu.memory_space<vmem>>, %arg7: memref<1x3x128xf32, #tpu.memory_space<vmem>>, %arg8: memref<1x3x128xf32, #tpu.memory_space<vmem>>) attributes {dimension_semantics = [#tpu.dimension_semantics<parallel>, #tpu.dimension_semantics<parallel>], iteration_bounds = array<i64: 1, 2>, scalar_prefetch = 0 : i64, scratch_operands = 0 : i64, tpu.core_type = #tpu.core_type<tc>, window_params = [{transform_indices = @transform_0, window_bounds = array<i64: 1, 5, 128>}, {transform_indices = @transform_1, window_bounds = array<i64: 1, 5, 128>}, {transform_indices = @transform_2, window_bounds = array<i64: 1, 1, 128>}, {transform_indices = @transform_3, window_bounds = array<i64: 1, 1, 128>}, {transform_indices = @transform_4, window_bounds = array<i64: 1, 1, 128>}, {transform_indices = @transform_5, window_bounds = array<i64: 1, 3, 128>}, {transform_indices = @transform_6, window_bounds = array<i64: 1, 3, 128>}]} {
    %c0 = arith.constant 0 : index
    %c0_0 = arith.constant 0 : index
    %c0_1 = arith.constant 0 : index
    %0 = vector.load %arg2[%c0, %c0_0, %c0_1] : memref<1x5x128xf32, #tpu.memory_space<vmem>>, vector<1x3x128xf32>
    %c0_2 = arith.constant 0 : index
    %c0_3 = arith.constant 0 : index
    %c0_4 = arith.constant 0 : index
    %1 = vector.load %arg3[%c0_2, %c0_3, %c0_4] : memref<1x5x128xf32, #tpu.memory_space<vmem>>, vector<1x3x128xf32>
    %c0_5 = arith.constant 0 : index
    %c3 = arith.constant 3 : index
    %c0_6 = arith.constant 0 : index
    %2 = vector.load %arg2[%c0_5, %c3, %c0_6] : memref<1x5x128xf32, #tpu.memory_space<vmem>>, vector<1x1x128xf32>
    %c0_7 = arith.constant 0 : index
    %c3_8 = arith.constant 3 : index
    %c0_9 = arith.constant 0 : index
    %3 = vector.load %arg3[%c0_7, %c3_8, %c0_9] : memref<1x5x128xf32, #tpu.memory_space<vmem>>, vector<1x1x128xf32>
    %c0_10 = arith.constant 0 : index
    %c4 = arith.constant 4 : index
    %c0_11 = arith.constant 0 : index
    %4 = vector.load %arg2[%c0_10, %c4, %c0_11] : memref<1x5x128xf32, #tpu.memory_space<vmem>>, vector<1x1x128xf32>
    %c0_12 = arith.constant 0 : index
    %c4_13 = arith.constant 4 : index
    %c0_14 = arith.constant 0 : index
    %5 = vector.load %arg3[%c0_12, %c4_13, %c0_14] : memref<1x5x128xf32, #tpu.memory_space<vmem>>, vector<1x1x128xf32>
    %6 = arith.subf %0, %1 : vector<1x3x128xf32>
    %7 = vector.extract_strided_slice %6 {offsets = [0, 0, 0], sizes = [1, 1, 128], strides = [1, 1, 1]} : vector<1x3x128xf32> to vector<1x1x128xf32>
    %8 = vector.extract_strided_slice %6 {offsets = [0, 0, 0], sizes = [1, 1, 128], strides = [1, 1, 1]} : vector<1x3x128xf32> to vector<1x1x128xf32>
    %9 = arith.mulf %7, %8 : vector<1x1x128xf32>
    %10 = vector.extract_strided_slice %6 {offsets = [0, 1, 0], sizes = [1, 1, 128], strides = [1, 1, 1]} : vector<1x3x128xf32> to vector<1x1x128xf32>
    %11 = vector.extract_strided_slice %6 {offsets = [0, 1, 0], sizes = [1, 1, 128], strides = [1, 1, 1]} : vector<1x3x128xf32> to vector<1x1x128xf32>
    %12 = arith.mulf %10, %11 : vector<1x1x128xf32>
    %13 = arith.addf %9, %12 : vector<1x1x128xf32>
    %14 = vector.extract_strided_slice %6 {offsets = [0, 2, 0], sizes = [1, 1, 128], strides = [1, 1, 1]} : vector<1x3x128xf32> to vector<1x1x128xf32>
    %15 = vector.extract_strided_slice %6 {offsets = [0, 2, 0], sizes = [1, 1, 128], strides = [1, 1, 1]} : vector<1x3x128xf32> to vector<1x1x128xf32>
    %16 = arith.mulf %14, %15 : vector<1x1x128xf32>
    %17 = arith.addf %13, %16 : vector<1x1x128xf32>
    %18 = math.rsqrt %17 : vector<1x1x128xf32>
    %19 = math.sqrt %17 : vector<1x1x128xf32>
    %c0_15 = arith.constant 0 : index
    %c0_16 = arith.constant 0 : index
    %c0_17 = arith.constant 0 : index
    %20 = vector.load %arg5[%c0_15, %c0_16, %c0_17] : memref<1x1x128xf32, #tpu.memory_space<vmem>>, vector<1x1x128xf32>
    %21 = arith.subf %19, %20 : vector<1x1x128xf32>
    %22 = arith.addf %4, %5 : vector<1x1x128xf32>
    %cst = arith.constant 5.000000e-01 : f32
    %23 = vector.broadcast %cst : f32 to vector<1x1x128xf32>
    %24 = arith.mulf %22, %23 : vector<1x1x128xf32>
    %25 = arith.addf %2, %3 : vector<1x1x128xf32>
    %c0_18 = arith.constant 0 : index
    %c0_19 = arith.constant 0 : index
    %c0_20 = arith.constant 0 : index
    %26 = vector.load %arg4[%c0_18, %c0_19, %c0_20] : memref<1x1x128xf32, #tpu.memory_space<vmem>>, vector<1x1x128xf32>
    %27 = arith.addf %25, %24 : vector<1x1x128xf32>
    %28 = tpu.reciprocal %27 : vector<1x1x128xf32> -> vector<1x1x128xf32>
    %cst_21 = arith.constant 0.000000e+00 : f32
    %29 = vector.broadcast %cst_21 : f32 to vector<1x1x128xf32>
    %30 = arith.cmpf oeq, %25, %29 : vector<1x1x128xf32>
    %cst_22 = arith.constant 0.000000e+00 : f32
    %31 = vector.broadcast %cst_22 : f32 to vector<1x1x128xf32>
    %32 = arith.subf %31, %21 : vector<1x1x128xf32>
    %33 = arith.mulf %24, %26 : vector<1x1x128xf32>
    %34 = arith.subf %32, %33 : vector<1x1x128xf32>
    %35 = arith.mulf %34, %28 : vector<1x1x128xf32>
    %cst_23 = arith.constant 0.000000e+00 : f32
    %36 = vector.broadcast %cst_23 : f32 to vector<1x1x128xf32>
    %37 = arith.select %30, %36, %35 : vector<1x1x128xi1>, vector<1x1x128xf32>
    %38 = arith.addf %26, %37 : vector<1x1x128xf32>
    %c0_24 = arith.constant 0 : index
    %c0_25 = arith.constant 0 : index
    %c0_26 = arith.constant 0 : index
    %39 = vector.load %arg6[%c0_24, %c0_25, %c0_26] : memref<1x1x128xf32, #tpu.memory_space<vmem>>, vector<1x1x128xf32>
    tpu.vector_store %arg6[%c0_24, %c0_25, %c0_26], %38 {strides = array<i32>} : memref<1x1x128xf32, #tpu.memory_space<vmem>>, vector<1x1x128xf32>,
    %40 = arith.mulf %37, %18 : vector<1x1x128xf32>
    %41 = arith.mulf %2, %40 : vector<1x1x128xf32>
    %42 = vector.broadcast %41 : vector<1x1x128xf32> to vector<1x3x128xf32>
    %43 = arith.mulf %42, %6 : vector<1x3x128xf32>
    %c0_27 = arith.constant 0 : index
    %c0_28 = arith.constant 0 : index
    %c0_29 = arith.constant 0 : index
    %44 = vector.load %arg7[%c0_27, %c0_28, %c0_29] : memref<1x3x128xf32, #tpu.memory_space<vmem>>, vector<1x3x128xf32>
    tpu.vector_store %arg7[%c0_27, %c0_28, %c0_29], %43 {strides = array<i32>} : memref<1x3x128xf32, #tpu.memory_space<vmem>>, vector<1x3x128xf32>,
    %45 = arith.mulf %3, %40 : vector<1x1x128xf32>
    %46 = vector.broadcast %45 : vector<1x1x128xf32> to vector<1x3x128xf32>
    %47 = arith.mulf %46, %6 : vector<1x3x128xf32>
    %c0_30 = arith.constant 0 : index
    %c0_31 = arith.constant 0 : index
    %c0_32 = arith.constant 0 : index
    %48 = vector.load %arg8[%c0_30, %c0_31, %c0_32] : memref<1x3x128xf32, #tpu.memory_space<vmem>>, vector<1x3x128xf32>
    tpu.vector_store %arg8[%c0_30, %c0_31, %c0_32], %47 {strides = array<i32>} : memref<1x3x128xf32, #tpu.memory_space<vmem>>, vector<1x3x128xf32>,
    return
  }
  func.func @transform_0(%arg0: i32, %arg1: i32) -> (i32, i32, i32) {
    %c0_i32 = arith.constant 0 : i32
    %c0_i32_0 = arith.constant 0 : i32
    return %arg1, %c0_i32, %arg0 : i32, i32, i32
  }
  func.func @transform_1(%arg0: i32, %arg1: i32) -> (i32, i32, i32) {
    %c0_i32 = arith.constant 0 : i32
    %c0_i32_0 = arith.constant 0 : i32
    return %arg1, %c0_i32, %arg0 : i32, i32, i32
  }
  func.func @transform_2(%arg0: i32, %arg1: i32) -> (i32, i32, i32) {
    %c0_i32 = arith.constant 0 : i32
    %c0_i32_0 = arith.constant 0 : i32
    return %arg1, %c0_i32, %arg0 : i32, i32, i32
  }
  func.func @transform_3(%arg0: i32, %arg1: i32) -> (i32, i32, i32) {
    %c0_i32 = arith.constant 0 : i32
    %c0_i32_0 = arith.constant 0 : i32
    %c0_i32_1 = arith.constant 0 : i32
    return %c0_i32, %c0_i32_0, %arg0 : i32, i32, i32
  }
  func.func @transform_4(%arg0: i32, %arg1: i32) -> (i32, i32, i32) {
    %c0_i32 = arith.constant 0 : i32
    %c0_i32_0 = arith.constant 0 : i32
    return %arg1, %c0_i32, %arg0 : i32, i32, i32
  }
  func.func @transform_5(%arg0: i32, %arg1: i32) -> (i32, i32, i32) {
    %c0_i32 = arith.constant 0 : i32
    %c0_i32_0 = arith.constant 0 : i32
    return %arg1, %c0_i32, %arg0 : i32, i32, i32
  }
  func.func @transform_6(%arg0: i32, %arg1: i32) -> (i32, i32, i32) {
    %c0_i32 = arith.constant 0 : i32
    %c0_i32_0 = arith.constant 0 : i32
    return %arg1, %c0_i32, %arg0 : i32, i32, i32
  }
}

</mosaic_0001>

<bundles_post_ra>
// kernel: project_c_dist_batch.1
= control target key start
LH: loop header
LB: loop body
LE: loop exit
PB: predicated region body
PF: predicated region fallthrough
CT: control target
= control target key end

     0   :  { %s744_s21 = smov 0   ;;  %s746_s22 = smov 0   ;;  %s804_s0 = inlined_call_operand.vmem [shape: f32[2,5,128], index: 0, kind: input, shape index: {}]   ;;  %s805_s1 = inlined_call_operand.vmem [shape: f32[2,5,128], index: 1, kind: input, shape index: {}]   ;;  %s806_s2 = inlined_call_operand.vmem [shape: f32[2,1,128], index: 2, kind: input, shape index: {}]   ;;  %s807_s3 = inlined_call_operand.vmem [shape: f32[1,1,128], index: 3, kind: input, shape index: {}]   ;;  %s808_s4 = inlined_call_operand.vmem [shape: f32[2,1,128], index: 4, kind: output, shape index: {0}]   ;;  %s809_s5 = inlined_call_operand.vmem [shape: f32[2,3,128], index: 5, kind: output, shape index: {1}]   ;;  %s810_s6 = inlined_call_operand.vmem [shape: f32[2,3,128], index: 6, kind: output, shape index: {2}]  }
   0x1   :  { %s748_s23 = smov 0  }
   0x2 LB: > { %s26_s24 = sadd.s32 1, %s703_s22  ;;  %p650_p0 = scmp.ge.s32.totalorder %s707_s23, 1  ;;  %s707_s23 = sphi %s748_s23, %s17_s23   ;;  %s703_s22 = sphi %s746_s22, %s812_s22   ;;  %s699_s21 = sphi %s744_s21, %s811_s21  }
   0x3   : > { %p27_p1 = scmp.ge.s32.totalorder %s26_s24, 2  ;;  %p274_p2 = scmp.lt.s32.totalorder %s707_s23, 3 }
   0x5   : > { %s814_s24 = smov (%p27_p1, %s26_s24), 0  ;;  %p275_p3 = pnand %p650_p0, %p274_p2 }
   0x6   : > { %p337_p4 = scmp.lt.s32.totalorder (!%p275_p3), %s699_s21, 1 }
   0x7   : > { %278 = sbr.rel (%p275_p3) target bundleno = 67 (0x43), region = 36 }
   0xc   : > { %s816_s21 = smov (!%p337_p4, %s699_s21), 1  ;;  %v417_v32 = vld [vmem:[%s807_s3] sm:$0x1] }
   0xd   : > { %s651_s25 = sshll.u32 %s816_s21, 3  ;;  %s356_s10 = scalar_lea.vmem %s806_s2, %s816_s21 }
   0xe   : > { %s343_s28 = scalar_lea.vmem %s804_s0, %s651_s25  ;;  %s350_s7 = scalar_lea.vmem %s805_s1, %s651_s25  ;;  %v422_v30 = vld [vmem:[%s356_s10] sm:$0x1] }
   0xf   : > { %v380_v0 = vld [vmem:[%s343_s28] sm:$0x7]  ;;  %v382_v2 = vld [vmem:[%s343_s28 + $0x3] sm:$0x1]  ;;  %v384_v4 = vld [vmem:[%s343_s28 + $0x4] sm:$0x1]  ;;  %s365_s15 = scalar_lea.vmem %s808_s4, %s816_s21 }
  0x10   : > { %v381_v1 = vld [vmem:[%s350_s7] sm:$0x7]  ;;  %v383_v3 = vld [vmem:[%s350_s7 + $0x3] sm:$0x1]  ;;  %v385_v5 = vld [vmem:[%s350_s7 + $0x4] sm:$0x1] }
  0x11   : > { %v771_v6 = vsub.f32 %v380_v0, %v381_v1  ;;  %v419_v7 = vadd.f32 %v385_v5, %v384_v4  ;;  %v421_v8 = vadd.f32 %v383_v3, %v382_v2  ;;  %s653_s16 = sshll.u32 %s816_s21, 2 }
  0x12   : > { %s372_s19 = scalar_lea.vmem %s809_s5, %s653_s16  ;;  %s379_s26 = scalar_lea.vmem %s810_s6, %s653_s16 }
  0x13   : > { %v387_v9 = vmul.f32 %v771_v6, %v771_v6  ;;  %v420_v10 = vmul.f32 0.5, %v419_v7  ;;  %vm438_vm9 = vcmp.eq.f32.partialorder %v421_v8, 0.0 }
  0x15   : > { %v389_v11 = vrot.slane %v387_v9, 1  ;;  %v392_v12 = vrot.slane %v387_v9, 2  ;;  %v423_v13 = vadd.f32 %v421_v8, %v420_v10  ;;  %v440_v36 = vmul.f32 %v422_v30, %v420_v10 }
  0x17   : > { %v391_v14 = vadd.f32 %v389_v11, %v387_v9  ;;  %681 = vrcp.f32 %v423_v13  ;;  %vm429_vm0 = vweird.f32 %v423_v13  ;;  %v433_v27 = vand.u32 2147483647, %v423_v13 }
  0x18   : > { %v435_v28 = vand.u32 2147483648, %v423_v13 }
  0x19   : > { %v394_v15 = vadd.f32 %v392_v12, %v391_v14  ;;  %vm434_vm5 = vcmp.eq.f32.partialorder %v433_v27, 8.507059e+37 }
  0x1a   : > { %v436_v35 = vor.u32 1.1754944e-38, %v435_v28 }
  0x1b   : > { %683 = vrsqrt.f32 %v394_v15  ;;  %vm412_vm2 = vcmp.eq.f32.partialorder %v394_v15, inf  ;;  %v415_v26 = vand.u32 2147483648, %v394_v15  ;;  %vm414_vm3 = vcmp.eq.f32.partialorder %v394_v15, 0.0 }
  0x1c   : > { %vm401_vm6 = vweird.f32 %v394_v15 }
  0x1d   : > { %v682_v16 = vpop.eup %681 }
  0x1e   : > { %v425_v17 = vmul.f32 %v682_v16, %v423_v13  ;;  %vm430_vm1 = vweird.f32 %v682_v16 }
  0x1f   : > { %vm431_vm4 = vmor %vm429_vm0, %vm430_vm1 }
  0x20   : > { %v426_v21 = vsub.f32 1.0, %v425_v17 }
  0x21   : > { %v684_v18 = vpop.eup %683 }
  0x22   : > { %v396_v19 = vmul.f32 %v684_v18, %v394_v15  ;;  %v427_v24 = vmul.f32 %v682_v16, %v426_v21  ;;  %vm402_vm7 = vweird.f32 %v684_v18 }
  0x23   : > { %vm403_vm8 = vmor %vm401_vm6, %vm402_vm7 }
  0x24   : > { %v397_v20 = vmul.f32 %v684_v18, %v396_v19  ;;  %v428_v31 = vadd.f32 %v682_v16, %v427_v24 }
  0x26   : > { %v398_v22 = vmul.f32 0.5, %v397_v20  ;;  %v432_v38 = vsel %vm431_vm4, %v682_v16, %v428_v31 }
  0x27   : > { %v437_v40 = vsel %vm434_vm5, %v436_v35, %v432_v38 }
  0x28   : > { %v399_v23 = vsub.f32 1.5, %v398_v22 }
  0x2a   : > { %v400_v25 = vmul.f32 %v684_v18, %v399_v23 }
  0x2c   : > { %v411_v29 = vmul.f32 %v400_v25, %v394_v15  ;;  %v404_v42 = vsel %vm403_vm8, %v684_v18, %v400_v25 }
  0x2e   : > { %v413_v33 = vsel %vm412_vm2, %v394_v15, %v411_v29 }
  0x2f   : > { %v416_v34 = vsel %vm414_vm3, %v415_v26, %v413_v33 }
  0x30   : > { %v418_v37 = vsub.f32 %v416_v34, %v417_v32 }
  0x32   : > { %v439_v39 = vsub.f32 0.0, %v418_v37 }
  0x34   : > { %v441_v41 = vsub.f32 %v439_v39, %v440_v36 }
  0x36   : > { %v442_v43 = vmul.f32 %v441_v41, %v437_v40 }
  0x38   : > { %v443_v44 = vsel %vm438_vm9, 0.0, %v442_v43 }
  0x39   : > { %v444_v45 = vadd.f32 %v443_v44, %v422_v30  ;;  %v446_v46 = vmul.f32 %v443_v44, %v404_v42 }
  0x3b   : > { %445 = vst [vmem:[%s365_s15] sm:$0x1] %v444_v45  ;;  %v447_v47 = vmul.f32 %v446_v46, %v382_v2  ;;  %v451_v48 = vmul.f32 %v446_v46, %v383_v3 }
  0x3d   : > { %v448_v49 = vperm.slane %v447_v47, 0  ;;  %v452_v50 = vperm.slane %v451_v48, 0 }
  0x3f   : > { %v449_v51 = vmul.f32 %v448_v49, %v771_v6  ;;  %v453_v52 = vmul.f32 %v452_v50, %v771_v6 }
  0x41   : > { %450 = vst [vmem:[%s372_s19] sm:$0x7] %v449_v51 }
  0x42   : > { %454 = vst [vmem:[%s379_s26] sm:$0x7] %v453_v52 }
  0x43 PF: > { %s17_s23 = sadd.s32 1, %s707_s23   ;;  %s811_s21 = smov %s703_s22 }
  0x44   : > { %p14_p5 = scmp.ge.s32.totalorder %s17_s23, 4   ;;  %s812_s22 = smov %s814_s24 }
  0x46   :  { %16 = sbr.rel (!%p14_p5) target bundleno = 2 (0x2), region = 99 }

</bundles_post_ra>
